<compile_context>
chip_gen: v7x
topology: tpu7x:2x2x1
jax: 0.10.0
libtpu: 0.0.40
codegen_flags: <defaults>
</compile_context>

<pallas_src>
import functools

import jax
import jax.numpy as jnp
from jax.experimental import pallas as pl
from jax.experimental.pallas import tpu as pltpu


def _se_kernel(x_ref, w1_ref, w2_ref, o_ref, *, inv_hw, use_mxu):
    # x_ref block: (Bt, C, HW).  Global average pool (AdaptiveAvgPool2d(1)),
    # accumulated in f32.  The pooled result is tiny, so nothing block-sized
    # in f32 stays live across the FC compute.
    pooled = jnp.sum(x_ref[...].astype(jnp.float32), axis=-1) * inv_hw    # (Bt, C)

    if use_mxu:
        # Large-C path: weights arrive pre-transposed (w1: (C, Cr), w2: (Cr, C)),
        # so both FCs are straight MXU matmuls with no in-kernel transpose.
        h = jnp.dot(pooled, w1_ref[...].astype(jnp.float32),
                    preferred_element_type=jnp.float32)                   # (Bt, Cr)
        h = jnp.maximum(h, 0.0)
        s = jnp.dot(h, w2_ref[...].astype(jnp.float32),
                    preferred_element_type=jnp.float32)                   # (Bt, C)
    else:
        # Tiny-C path: keep the FCs on the VPU/XLU (broadcast multiply + lane
        # reduce) — an N=1 MXU matvec would pay full tile latency for <1% util.
        # w1: (Cr, C), w2: (C, Cr).
        h = jnp.sum(pooled[:, None, :] * w1_ref[...][None].astype(jnp.float32),
                    axis=-1)                                              # (Bt, Cr)
        h = jnp.maximum(h, 0.0)
        s = jnp.sum(h[:, None, :] * w2_ref[...][None].astype(jnp.float32),
                    axis=-1)                                              # (Bt, C)
    s = jax.nn.sigmoid(s)

    # Re-read the (still VMEM-resident) input for the scale multiply instead of
    # keeping an upcast copy of the whole block live; multiply in the source
    # dtype (native bf16 VPU on v6e/v7x, exact for f32).
    o_ref[...] = x_ref[...] * s.astype(o_ref.dtype)[:, :, None]


def _pick_bt(B, per_batch_bytes):
    """Batch block size: VMEM-safe, >= min(B,4) grid steps, prefer even steps."""
    # Budget ~10 MiB total across 2 input + 2 output double-buffers + f32
    # pooling temp (6x margin) so the v5e 16 MiB scoped default always fits.
    budget = 10 * 1024 * 1024
    bt_vmem = max(1, budget // (6 * max(per_batch_bytes, 1)))
    # Pipeline overlap: never collapse to a single grid step when B > 1.
    min_steps = min(B, 4)
    bt_pipe = max(1, B // min_steps)
    bt_cap = max(1, min(B, bt_vmem, bt_pipe))
    divs = [d for d in range(bt_cap, 0, -1) if B % d == 0]
    best = divs[0]
    # Prefer an even number of grid steps (v7x: 2 TCs share HBM) if it doesn't
    # shrink the block by more than 2x.
    for d in divs:
        if (B // d) % 2 == 0:
            if d * 2 >= best:
                best = d
            break
    return best


@jax.jit
def squeeze_excitation(x, w1, w2):
    """x: (B, C, H, W); w1: (C//r, C); w2: (C, C//r)."""
    B, C, H, W = x.shape
    HW = H * W
    Cr = w1.shape[0]

    # Flatten spatial dims (a free view).  No padding: the block's last dim is
    # the full HW extent, so tail stores are hardware-masked instead of paying
    # two extra HBM passes for pad + slice.
    x_flat = x.reshape(B, C, HW)

    per_batch_bytes = C * HW * x_flat.dtype.itemsize
    bt = _pick_bt(B, per_batch_bytes)
    grid = (B // bt,)
    # TODO(synk): for very large C*HW (e.g. C=2048, HW=3136 f32, ~26 MiB/slab —
    # too big for v7x's 64 MiB VMEM even single-buffered) switch to a two-pass
    # HW-tiled variant: pass 1 accumulates per-channel sums over an 'arbitrary'
    # HW grid axis and computes the sigmoid scale on the last tile, pass 2
    # applies it tile-by-tile.

    # MXU only pays off for the FCs when C / Cr are big enough to fill tiles.
    use_mxu = (C >= 512 and Cr >= 32)
    if use_mxu:
        w1_pass, w2_pass = w1.T, w2.T        # (C, Cr), (Cr, C) — tiny one-time cost
    else:
        w1_pass, w2_pass = w1, w2            # (Cr, C), (C, Cr)

    cost = pl.CostEstimate(
        flops=2 * B * C * HW + 4 * B * C * Cr,
        transcendentals=B * C,
        bytes_accessed=2 * B * C * HW * x.dtype.itemsize
        + (w1.size + w2.size) * w1.dtype.itemsize,
    )

    kernel = functools.partial(_se_kernel, inv_hw=1.0 / HW, use_mxu=use_mxu)
    out = pl.pallas_call(
        kernel,
        out_shape=jax.ShapeDtypeStruct((B, C, HW), x.dtype),
        grid_spec=pltpu.PrefetchScalarGridSpec(
            num_scalar_prefetch=0,
            grid=grid,
            in_specs=[
                pl.BlockSpec((bt, C, HW), lambda b: (b, 0, 0)),
                pl.BlockSpec(w1_pass.shape, lambda b: (0, 0)),
                pl.BlockSpec(w2_pass.shape, lambda b: (0, 0)),
            ],
            out_specs=pl.BlockSpec((bt, C, HW), lambda b: (b, 0, 0)),
        ),
        compiler_params=pltpu.CompilerParams(
            dimension_semantics=("parallel",)),
        cost_estimate=cost,
    )(x_flat, w1_pass, w2_pass)

    return out.reshape(B, C, H, W)


def _reference(x, w1, w2):
    # Pure-JAX reference reproducing the PyTorch forward pass.
    y = jnp.mean(x, axis=(2, 3))                       # (B, C)
    y = jnp.maximum(y @ w1.T, 0.0)                     # (B, C//r)
    y = jax.nn.sigmoid(y @ w2.T)                       # (B, C)
    return x * y[:, :, None, None]


if __name__ == "__main__":
    # Module config: channel=32, reduction=16  ->  hidden = 32 // 16 = 2
    B, C, H, W = 2, 32, 16, 16
    reduction = 16
    Cr = C // reduction

    key = jax.random.PRNGKey(0)
    kx, k1, k2 = jax.random.split(key, 3)

    x = jax.random.normal(kx, (B, C, H, W), dtype=jnp.float32)
    # Deterministic init mimicking nn.Linear default (uniform ±1/sqrt(fan_in)).
    w1 = jax.random.uniform(k1, (Cr, C), jnp.float32,
                            minval=-1.0 / (C ** 0.5), maxval=1.0 / (C ** 0.5))
    w2 = jax.random.uniform(k2, (C, Cr), jnp.float32,
                            minval=-1.0 / (Cr ** 0.5), maxval=1.0 / (Cr ** 0.5))

    out = squeeze_excitation(x, w1, w2)
    out = jax.block_until_ready(out)

    ref = _reference(x, w1, w2)
    assert out.shape == (B, C, H, W)
    assert jnp.allclose(out, ref, atol=1e-5, rtol=1e-5)

    print("KERNEL_OK")
</pallas_src>

<mosaic_0001>
module attributes {stable_mosaic.version = 11 : i64} {
  func.func @_se_kernel(%arg0: i32, %arg1: memref<1x32x256xf32, #tpu.memory_space<vmem>>, %arg2: memref<2x32xf32, #tpu.memory_space<vmem>>, %arg3: memref<32x2xf32, #tpu.memory_space<vmem>>, %arg4: memref<1x32x256xf32, #tpu.memory_space<vmem>>) attributes {dimension_semantics = [#tpu.dimension_semantics<parallel>], iteration_bounds = array<i64: 2>, scalar_prefetch = 0 : i64, scratch_operands = 0 : i64, tpu.core_type = #tpu.core_type<tc>, window_params = [{transform_indices = @transform_0, window_bounds = array<i64: 1, 32, 256>}, {pipeline_mode = #tpu.pipeline_mode<synchronous>, transform_indices = @transform_1, window_bounds = array<i64: 2, 32>}, {pipeline_mode = #tpu.pipeline_mode<synchronous>, transform_indices = @transform_2, window_bounds = array<i64: 32, 2>}, {transform_indices = @transform_3, window_bounds = array<i64: 1, 32, 256>}]} {
    %c0 = arith.constant 0 : index
    %c0_0 = arith.constant 0 : index
    %c0_1 = arith.constant 0 : index
    %0 = vector.load %arg1[%c0, %c0_0, %c0_1] : memref<1x32x256xf32, #tpu.memory_space<vmem>>, vector<1x32x256xf32>
    %cst = arith.constant dense<0.000000e+00> : vector<1x32xf32>
    %1 = vector.multi_reduction <add>, %0, %cst [2] : vector<1x32x256xf32> to vector<1x32xf32>
    %cst_2 = arith.constant 3.906250e-03 : f32
    %2 = vector.broadcast %cst_2 : f32 to vector<1x32xf32>
    %3 = arith.mulf %1, %2 : vector<1x32xf32>
    %4 = vector.shape_cast %3 : vector<1x32xf32> to vector<1x1x32xf32>
    %c0_3 = arith.constant 0 : index
    %c0_4 = arith.constant 0 : index
    %5 = vector.load %arg2[%c0_3, %c0_4] : memref<2x32xf32, #tpu.memory_space<vmem>>, vector<2x32xf32>
    %6 = vector.shape_cast %5 : vector<2x32xf32> to vector<1x2x32xf32>
    %7 = vector.broadcast %4 : vector<1x1x32xf32> to vector<1x2x32xf32>
    %8 = arith.mulf %7, %6 : vector<1x2x32xf32>
    %cst_5 = arith.constant dense<0.000000e+00> : vector<1x2xf32>
    %9 = vector.multi_reduction <add>, %8, %cst_5 [2] : vector<1x2x32xf32> to vector<1x2xf32>
    %cst_6 = arith.constant 0.000000e+00 : f32
    %10 = vector.broadcast %cst_6 : f32 to vector<1x2xf32>
    %11 = arith.maximumf %9, %10 : vector<1x2xf32>
    %12 = vector.shape_cast %11 : vector<1x2xf32> to vector<1x1x2xf32>
    %c0_7 = arith.constant 0 : index
    %c0_8 = arith.constant 0 : index
    %13 = vector.load %arg3[%c0_7, %c0_8] : memref<32x2xf32, #tpu.memory_space<vmem>>, vector<32x2xf32>
    %14 = vector.shape_cast %13 : vector<32x2xf32> to vector<1x32x2xf32>
    %15 = vector.broadcast %12 : vector<1x1x2xf32> to vector<1x32x2xf32>
    %16 = arith.mulf %15, %14 : vector<1x32x2xf32>
    %cst_9 = arith.constant dense<0.000000e+00> : vector<1x32xf32>
    %17 = vector.multi_reduction <add>, %16, %cst_9 [2] : vector<1x32x2xf32> to vector<1x32xf32>
    %18 = arith.negf %17 : vector<1x32xf32>
    %19 = math.exp %18 : vector<1x32xf32>
    %cst_10 = arith.constant 1.000000e+00 : f32
    %20 = vector.broadcast %cst_10 : f32 to vector<1x32xf32>
    %21 = arith.addf %20, %19 : vector<1x32xf32>
    %22 = arith.divf %20, %21 : vector<1x32xf32>
    %c0_11 = arith.constant 0 : index
    %c0_12 = arith.constant 0 : index
    %c0_13 = arith.constant 0 : index
    %23 = vector.load %arg1[%c0_11, %c0_12, %c0_13] : memref<1x32x256xf32, #tpu.memory_space<vmem>>, vector<1x32x256xf32>
    %24 = vector.shape_cast %22 : vector<1x32xf32> to vector<1x32x1xf32>
    %25 = vector.broadcast %24 : vector<1x32x1xf32> to vector<1x32x256xf32>
    %26 = arith.mulf %23, %25 : vector<1x32x256xf32>
    %c0_14 = arith.constant 0 : index
    %c0_15 = arith.constant 0 : index
    %c0_16 = arith.constant 0 : index
    %27 = vector.load %arg4[%c0_14, %c0_15, %c0_16] : memref<1x32x256xf32, #tpu.memory_space<vmem>>, vector<1x32x256xf32>
    tpu.vector_store %arg4[%c0_14, %c0_15, %c0_16], %26 {strides = array<i32>} : memref<1x32x256xf32, #tpu.memory_space<vmem>>, vector<1x32x256xf32>,
    return
  }
  func.func @transform_0(%arg0: i32) -> (i32, i32, i32) {
    %c0_i32 = arith.constant 0 : i32
    %c0_i32_0 = arith.constant 0 : i32
    %c0_i32_1 = arith.constant 0 : i32
    return %arg0, %c0_i32, %c0_i32_0 : i32, i32, i32
  }
  func.func @transform_1(%arg0: i32) -> (i32, i32) {
    %c0_i32 = arith.constant 0 : i32
    %c0_i32_0 = arith.constant 0 : i32
    %c0_i32_1 = arith.constant 0 : i32
    return %c0_i32, %c0_i32_0 : i32, i32
  }
  func.func @transform_2(%arg0: i32) -> (i32, i32) {
    %c0_i32 = arith.constant 0 : i32
    %c0_i32_0 = arith.constant 0 : i32
    %c0_i32_1 = arith.constant 0 : i32
    return %c0_i32, %c0_i32_0 : i32, i32
  }
  func.func @transform_3(%arg0: i32) -> (i32, i32, i32) {
    %c0_i32 = arith.constant 0 : i32
    %c0_i32_0 = arith.constant 0 : i32
    %c0_i32_1 = arith.constant 0 : i32
    return %arg0, %c0_i32, %c0_i32_0 : i32, i32, i32
  }
}

</mosaic_0001>

<bundles_post_ra>
// kernel: squeeze_excitation.1
= control target key start
LH: loop header
LB: loop body
LE: loop exit
PB: predicated region body
PF: predicated region fallthrough
CT: control target
= control target key end

     0   :  { %s1108_s12 = smov 0   ;;  %s1355_s0 = inlined_call_operand.vmem [shape: f32[2,32,256], index: 0, kind: input, shape index: {}]   ;;  %s1356_s1 = inlined_call_operand.vmem [shape: f32[2,32], index: 1, kind: input, shape index: {}]   ;;  %s1357_s2 = inlined_call_operand.vmem [shape: f32[32,2], index: 2, kind: input, shape index: {}]   ;;  %s1358_s3 = inlined_call_operand.vmem [shape: f32[2,32,256], index: 3, kind: output, shape index: {}]  }
   0x1 LB: > { %s1035_s13 = sadd.s32 4294967295, %s1085_s12   ;;  %p1039_p0 = scmp.ge.s32.totalorder %s1085_s12, 1  ;;  %s1085_s12 = sphi %s1108_s12, %s13_s12  }
   0x2   : > { %p137_p1 = scmp.lt.s32.totalorder %s1085_s12, 3 }
   0x4   : > { %p138_p2 = pnand %p1039_p0, %p137_p1 }
   0x5   : > { %p161_p3 = scmp.lt.s32.totalorder (!%p138_p2), %s1035_s13, 1  ;;  %v197_v12 = vlaneseq (!%p138_p2)  ;;  %v195_v15 = vld [vmem:[%s1356_s1] sm:$0x3] (!%p138_p2)  ;;  %v1087_v19 = vmov (!%p138_p2), 0   ;;  %v338_v41 = vld [vmem:[%s1357_s2 + $0x8] sm:$0xff] (!%p138_p2)  ;;  %v340_v47 = vld [vmem:[%s1357_s2 + $0x18] sm:$0xff] (!%p138_p2) }
   0x6   : > { %141 = sbr.rel (%p138_p2) target bundleno = 833 (0x341), region = 32  ;;  %1062 = vset.pattern.permute.xlu1 (!%p138_p2), %v1087_v19  ;;  %1061 = vset.pattern.permute.xlu0 (!%p138_p2), %v1087_v19  ;;  %v1173_v48 = vld [vmem:[%s1357_s2] sm:$0xff] (!%p138_p2)  ;;  %v339_v60 = vld [vmem:[%s1357_s2 + $0x10] sm:$0xff] (!%p138_p2)  ;;  %vm294_vm0 = vcmask (!%p138_p2), 130112   ;;  %vm301_vm1 = vcmask (!%p138_p2), 195712   ;;  %vm308_vm2 = vcmask (!%p138_p2), 261312  }
   0x7   : > { %v1149_v13 = vshrl.u32 (!%p138_p2), %v197_v12, 7  ;;  %vm329_vm3 = vcmask (!%p138_p2), 1041409   ;;  %vm332_vm4 = vcmask (!%p138_p2), 254976   ;;  %vm890_vm5 = vcmask (!%p138_p2), 1042434  }
   0x8   : > { %vm892_vm6 = vcmask (!%p138_p2), 1043459   ;;  %vm894_vm7 = vcmask (!%p138_p2), 1044484   ;;  %vm896_vm8 = vcmask (!%p138_p2), 1045509   ;;  %vm898_vm9 = vcmask (!%p138_p2), 1046534  }
   0x9   : > { %v1152_v14 = vsub.s32 (!%p138_p2), 0, %v1149_v13  ;;  %v1159_v17 = vsub.s32 (!%p138_p2), 1, %v1149_v13  ;;  %v361_v39 = vsub.s32 (!%p138_p2), 2, %v1149_v13  ;;  %v368_v45 = vsub.s32 (!%p138_p2), 3, %v1149_v13 }
   0xa   : > { %v375_v51 = vsub.s32 (!%p138_p2), 4, %v1149_v13  ;;  %v382_v56 = vsub.s32 (!%p138_p2), 5, %v1149_v13  ;;  %v389_v62 = vsub.s32 (!%p138_p2), 6, %v1149_v13  ;;  %vm900_vm10 = vcmask (!%p138_p2), 1047559  }
   0xb   : > { %v200_v16 = vrot.slane (!%p138_p2), %v195_v15, %v1152_v14  ;;  %v219_v18 = vrot.slane (!%p138_p2), %v195_v15, %v1159_v17  ;;  %v418_v44 = vrot.slane (!%p138_p2), %v338_v41, %v361_v39  ;;  %v537_v50 = vrot.slane (!%p138_p2), %v340_v47, %v368_v45 }
   0xc   : > { %v348_v52 = vrot.slane (!%p138_p2), %v1173_v48, %v1152_v14  ;;  %v432_v53 = vrot.slane (!%p138_p2), %v338_v41, %v375_v51  ;;  %v355_v54 = vrot.slane (!%p138_p2), %v1173_v48, %v1159_v17  ;;  %v544_v55 = vrot.slane (!%p138_p2), %v340_v47, %v375_v51 }
   0xd   : > { %s1360_s13 = smov (!%p161_p3, %s1035_s13), 1  ;;  %v404_v57 = vrot.slane %v338_v41, %v1152_v14  ;;  %v439_v58 = vrot.slane %v338_v41, %v382_v56  ;;  %v411_v59 = vrot.slane %v338_v41, %v1159_v17  ;;  %v551_v61 = vrot.slane %v340_v47, %v382_v56 }
   0xe   : > { %s1050_s14 = sshll.u32 %s1360_s13, 6  ;;  %v460_v63 = vrot.slane %v339_v60, %v1152_v14  ;;  %v516_v15 = vrot.slane %v340_v47, %v1152_v14  ;;  %v425_v14 = vrot.slane %v338_v41, %v368_v45  ;;  %vm927_vm11 = vcmask 15360  }
   0xf   : > { %s165_s17 = scalar_lea.vmem %s1355_s0, %s1050_s14  ;;  %s170_s30 = scalar_lea.vmem %s1358_s3, %s1050_s14 }
  0x10   : > { %v1124_v0 = vld [vmem:[%s165_s17 + $0x20] sm:$0xff]  ;;  %v1126_v1 = vld [vmem:[%s165_s17 + $0x28] sm:$0xff]  ;;  %v1134_v5 = vld [vmem:[%s165_s17 + $0x30] sm:$0xff] }
  0x11   : > { %v1128_v2 = vld [vmem:[%s165_s17] sm:$0xff]  ;;  %v185_v3 = vadd.f32 %v1126_v1, %v1124_v0  ;;  %v1132_v4 = vld [vmem:[%s165_s17 + $0x8] sm:$0xff]  ;;  %v1136_v6 = vld [vmem:[%s165_s17 + $0x38] sm:$0xff] }
  0x12   : > { %v179_v7 = vadd.f32 %v1132_v4, %v1128_v2  ;;  %v1140_v8 = vld [vmem:[%s165_s17 + $0x10] sm:$0xff]  ;;  %v1142_v9 = vld [vmem:[%s165_s17 + $0x18] sm:$0xff]  ;;  %v188_v10 = vadd.f32 %v1136_v6, %v1134_v5 }
  0x13   : > { %186 = vadd.xlane.f32.xlu1 %v185_v3  ;;  %v182_v11 = vadd.f32 %v1142_v9, %v1140_v8  ;;  %v446_v3 = vrot.slane %v338_v41, %v389_v62 }
  0x14   : > { %180 = vadd.xlane.f32.xlu0 %v179_v7  ;;  %v467_v7 = vrot.slane %v339_v60, %v1159_v17 }
  0x17   : > { %189 = vadd.xlane.f32.xlu1 %v188_v10  ;;  %v558_v10 = vrot.slane %v340_v47, %v389_v62 }
  0x18   : > { %183 = vadd.xlane.f32.xlu0 %v182_v11  ;;  %v396_v11 = vsub.s32 7, %v1149_v13 }
  0x1a   : > { %v565_v19 = vrot.slane %v340_v47, %v396_v11 }
  0x28   : > { %206 = vbcast.lane.b32.xlu1 %v200_v16, 264 }
  0x2c   : > { %221 = vbcast.lane.b32.xlu1 %v219_v18, 256 }
  0x2e   : > { %202 = vbcast.lane.b32.xlu0 %v200_v16, 256 }
  0x30   : > { %225 = vbcast.lane.b32.xlu1 %v219_v18, 264 }
  0x32   : > { %210 = vbcast.lane.b32.xlu0 %v200_v16, 272 }
  0x34   : > { %229 = vbcast.lane.b32.xlu1 %v219_v18, 272 }
  0x36   : > { %214 = vbcast.lane.b32.xlu0 %v200_v16, 280  ;;  %v453_v16 = vrot.slane %v338_v41, %v396_v11 }
  0x38   : > { %233 = vbcast.lane.b32.xlu1 %v219_v18, 280  ;;  %v523_v18 = vrot.slane %v340_v47, %v1159_v17  ;;  %v376_v17 = vrot.slane %v1173_v48, %v375_v51 }
  0xa0   : > { %v187_v20 = vpop.xlane.xlu1 %186 }
  0xa1   : > { %v181_v21 = vpop.xlane.xlu0 %180  ;;  %v193_v33 = vmul.f32 0.00390625, %v187_v20  ;;  %v362_v20 = vrot.slane %v1173_v48, %v361_v39 }
  0xa2   : > { %v191_v25 = vmul.f32 0.00390625, %v181_v21  ;;  %v474_v21 = vrot.slane %v339_v60, %v361_v39 }
  0xa4   : > { %v190_v22 = vpop.xlane.xlu1 %189 }
  0xa5   : > { %v184_v23 = vpop.xlane.xlu0 %183  ;;  %v194_v38 = vmul.f32 0.00390625, %v190_v22  ;;  %v530_v22 = vrot.slane %v340_v47, %v361_v39 }
  0xa6   : > { %v192_v24 = vmul.f32 0.00390625, %v184_v23  ;;  %v369_v23 = vrot.slane %v1173_v48, %v368_v45 }
  0xa8   : > { %v207_v26 = vpop.permute.xlu1 %206 }
  0xa9   : > { %v244_v27 = vmul.f32 %v207_v26, %v192_v24  ;;  %v203_v28 = vpop.permute.xlu0 %202  ;;  %v383_v26 = vrot.slane %v1173_v48, %v382_v56 }
  0xaa   : > { %v243_v29 = vmul.f32 %v203_v28, %v191_v25  ;;  %v390_v28 = vrot.slane %v1173_v48, %v389_v62 }
  0xab   : > { %263 = vperm.xlu1 %1062, %v244_v27   ;;  %v495_v27 = vrot.slane %v339_v60, %v382_v56 }
  0xac   : > { %260 = vperm.xlu0 %1061, %v243_v29   ;;  %v222_v30 = vpop.permute.xlu1 %221  ;;  %v502_v29 = vrot.slane %v339_v60, %v389_v62 }
  0xad   : > { %v247_v31 = vmul.f32 %v222_v30, %v191_v25  ;;  %v211_v32 = vpop.permute.xlu0 %210  ;;  %v488_v25 = vrot.slane %v339_v60, %v375_v51  ;;  %v397_v30 = vrot.slane %v1173_v48, %v396_v11 }
  0xae   : > { %v245_v35 = vmul.f32 %v211_v32, %v193_v33 }
  0xaf   : > { %272 = vperm.xlu1 %1062, %v247_v31   ;;  %v509_v31 = vrot.slane %v339_v60, %v396_v11 }
  0xb0   : > { %v226_v34 = vpop.permute.xlu1 %225 }
  0xb1   : > { %v248_v36 = vmul.f32 %v226_v34, %v192_v24  ;;  %v215_v37 = vpop.permute.xlu0 %214  ;;  %v481_v24 = vrot.slane %v339_v60, %v368_v45 }
  0xb2   : > { %v246_v42 = vmul.f32 %v215_v37, %v194_v38 }
  0xb3   : > { %275 = vperm.xlu0 %1061, %v248_v36   ;;  %266 = vperm.xlu1 %1062, %v245_v35  }
  0xb4   : > { %v230_v40 = vpop.permute.xlu1 %229 }
  0xb5   : > { %v249_v43 = vmul.f32 %v230_v40, %v193_v33  ;;  %v284_v33 = vand.u32 127, %v197_v12 }
  0xb7   : > { %278 = vperm.xlu0 %1061, %v249_v43   ;;  %269 = vperm.xlu1 %1062, %v246_v42   ;;  %v289_v36 = vadd.s32 4294967288, %v284_v33  ;;  %v296_v37 = vadd.s32 4294967280, %v284_v33  ;;  %v1200_v41 = vsub.s32 %v284_v33, %v1149_v13 }
  0xb8   : > { %v234_v46 = vpop.permute.xlu1 %233 }
  0xb9   : > { %v250_v49 = vmul.f32 %v234_v46, %v194_v38  ;;  %v303_v38 = vadd.s32 4294967272, %v284_v33  ;;  %v292_v42 = vsub.s32 %v289_v36, %v1149_v13  ;;  %v299_v43 = vsub.s32 %v296_v37, %v1149_v13 }
  0xbb   : > { %281 = vperm.xlu0 %1061, %v250_v49   ;;  %420 = vbcast.lane.b32.xlu1 %v418_v44, 256  ;;  %v306_v44 = vsub.s32 %v303_v38, %v1149_v13 }
  0xbf   : > { %539 = vbcast.lane.b32.xlu1 %v537_v50, 256  ;;  %350 = vbcast.lane.b32.xlu0 %v348_v52, 256 }
  0xc3   : > { %434 = vbcast.lane.b32.xlu1 %v432_v53, 256  ;;  %357 = vbcast.lane.b32.xlu0 %v355_v54, 256 }
  0xc7   : > { %546 = vbcast.lane.b32.xlu1 %v544_v55, 256  ;;  %406 = vbcast.lane.b32.xlu0 %v404_v57, 256 }
  0xcb   : > { %441 = vbcast.lane.b32.xlu1 %v439_v58, 256  ;;  %413 = vbcast.lane.b32.xlu0 %v411_v59, 256 }
  0xcf   : > { %553 = vbcast.lane.b32.xlu1 %v551_v61, 256  ;;  %462 = vbcast.lane.b32.xlu0 %v460_v63, 256 }
  0xd3   : > { %448 = vbcast.lane.b32.xlu1 %v446_v3, 256  ;;  %469 = vbcast.lane.b32.xlu0 %v467_v7, 256 }
  0xd7   : > { %560 = vbcast.lane.b32.xlu1 %v558_v10, 256  ;;  %518 = vbcast.lane.b32.xlu0 %v516_v15, 256 }
  0xdb   : > { %455 = vbcast.lane.b32.xlu1 %v453_v16, 256  ;;  %525 = vbcast.lane.b32.xlu0 %v523_v18, 256 }
  0xdf   : > { %567 = vbcast.lane.b32.xlu1 %v565_v19, 256  ;;  %364 = vbcast.lane.b32.xlu0 %v362_v20, 256 }
  0xe3   : > { %476 = vbcast.lane.b32.xlu0 %v474_v21, 256 }
  0xe7   : > { %532 = vbcast.lane.b32.xlu0 %v530_v22, 256 }
  0xeb   : > { %371 = vbcast.lane.b32.xlu0 %v369_v23, 256 }
  0xef   : > { %427 = vbcast.lane.b32.xlu0 %v425_v14, 256 }
  0xf3   : > { %483 = vbcast.lane.b32.xlu0 %v481_v24, 256 }
  0xf7   : > { %378 = vbcast.lane.b32.xlu0 %v376_v17, 256 }
  0xfb   : > { %490 = vbcast.lane.b32.xlu0 %v488_v25, 256 }
  0xff   : > { %385 = vbcast.lane.b32.xlu0 %v383_v26, 256 }
 0x103   : > { %497 = vbcast.lane.b32.xlu0 %v495_v27, 256 }
 0x107   : > { %392 = vbcast.lane.b32.xlu0 %v390_v28, 256 }
 0x10b   : > { %504 = vbcast.lane.b32.xlu0 %v502_v29, 256 }
 0x10f   : > { %399 = vbcast.lane.b32.xlu0 %v397_v30, 256 }
 0x113   : > { %511 = vbcast.lane.b32.xlu0 %v509_v31, 256 }
 0x12a   : > { %v264_v32 = vpop.permute.xlu1 %263 }
 0x12b   : > { %v261_v34 = vpop.permute.xlu0 %260  ;;  %v293_v47 = vrot.slane %v264_v32, %v292_v42 }
 0x12c   : > { %v288_v12 = vrot.slane %v261_v34, %v1200_v41 }
 0x12e   : > { %v273_v35 = vpop.permute.xlu1 %272  ;;  %v295_v54 = vsel %vm294_vm0, %v293_v47, %v288_v12 }
 0x12f   : > { %v313_v51 = vrot.slane %v273_v35, %v1200_v41 }
 0x132   : > { %v267_v39 = vpop.permute.xlu1 %266  ;;  %v276_v40 = vpop.permute.xlu0 %275 }
 0x133   : > { %v317_v48 = vrot.slane %v276_v40, %v292_v42  ;;  %v300_v49 = vrot.slane %v267_v39, %v299_v43 }
 0x135   : > { %v318_v55 = vsel %vm294_vm0, %v317_v48, %v313_v51  ;;  %v302_v13 = vsel %vm301_vm1, %v300_v49, %v295_v54 }
 0x136   : > { %v270_v45 = vpop.permute.xlu1 %269  ;;  %v279_v46 = vpop.permute.xlu0 %278 }
 0x137   : > { %v322_v50 = vrot.slane %v279_v46, %v299_v43  ;;  %v307_v52 = vrot.slane %v270_v45, %v306_v44 }
 0x139   : > { %v323_v57 = vsel %vm301_vm1, %v322_v50, %v318_v55  ;;  %v309_v58 = vsel %vm308_vm2, %v307_v52, %v302_v13 }
 0x13a   : > { %v282_v53 = vpop.permute.xlu0 %281  ;;  %v421_v3 = vpop.permute.xlu1 %420 }
 0x13b   : > { %v327_v56 = vrot.slane %v282_v53, %v306_v44 }
 0x13d   : > { %v328_v59 = vsel %vm308_vm2, %v327_v56, %v323_v57 }
 0x13e   : > { %v330_v60 = vsel %vm329_vm3, %v328_v59, %v309_v58  ;;  %v351_v62 = vpop.permute.xlu0 %350  ;;  %v540_v10 = vpop.permute.xlu1 %539 }
 0x13f   : > { %v333_v61 = vsel %vm332_vm4, %v330_v60, 0.0 }
 0x140   : > { %334 = vadd.xlane.f32.xlu1 %v333_v61 }
 0x142   : > { %v358_v63 = vpop.permute.xlu0 %357  ;;  %v435_v15 = vpop.permute.xlu1 %434 }
 0x146   : > { %v407_v7 = vpop.permute.xlu0 %406  ;;  %v547_v18 = vpop.permute.xlu1 %546 }
 0x14a   : > { %v414_v11 = vpop.permute.xlu0 %413  ;;  %v442_v20 = vpop.permute.xlu1 %441 }
 0x14e   : > { %v463_v16 = vpop.permute.xlu0 %462  ;;  %v1208_v22 = vpop.permute.xlu1 %553 }
 0x152   : > { %v470_v19 = vpop.permute.xlu0 %469  ;;  %v1210_v14 = vpop.permute.xlu1 %448 }
 0x156   : > { %v519_v21 = vpop.permute.xlu0 %518  ;;  %v1212_v17 = vpop.permute.xlu1 %560 }
 0x15a   : > { %v526_v23 = vpop.permute.xlu0 %525  ;;  %v1214_v26 = vpop.permute.xlu1 %455 }
 0x15e   : > { %v365_v24 = vpop.permute.xlu0 %364  ;;  %v1216_v28 = vpop.permute.xlu1 %567 }
 0x162   : > { %v477_v25 = vpop.permute.xlu0 %476 }
 0x166   : > { %v533_v27 = vpop.permute.xlu0 %532 }
 0x16a   : > { %v372_v29 = vpop.permute.xlu0 %371 }
 0x16e   : > { %v428_v34 = vpop.permute.xlu0 %427 }
 0x172   : > { %v484_v38 = vpop.permute.xlu0 %483 }
 0x176   : > { %v379_v43 = vpop.permute.xlu0 %378 }
 0x17a   : > { %v491_v47 = vpop.permute.xlu0 %490 }
 0x17e   : > { %v386_v50 = vpop.permute.xlu0 %385 }
 0x182   : > { %v498_v54 = vpop.permute.xlu0 %497 }
 0x186   : > { %v393_v57 = vpop.permute.xlu0 %392 }
 0x18a   : > { %v505_v61 = vpop.permute.xlu0 %504 }
 0x1cd   : > { %v335_v30 = vpop.xlane.xlu1 %334 }
 0x1ce   : > { %v1218_v31 = vmax.f32 %v335_v30, 0.0 }
 0x1d0   : > { %v601_v32 = vmul.f32 %v351_v62, %v1218_v31  ;;  %v602_v33 = vmul.f32 %v358_v63, %v1218_v31  ;;  %v609_v35 = vmul.f32 %v407_v7, %v1218_v31  ;;  %v610_v36 = vmul.f32 %v414_v11, %v1218_v31  ;;  %v400_v7 = vpop.permute.xlu0 %399 }
 0x1d1   : > { %v617_v37 = vmul.f32 %v463_v16, %v1218_v31  ;;  %v618_v39 = vmul.f32 %v470_v19, %v1218_v31  ;;  %v625_v40 = vmul.f32 %v519_v21, %v1218_v31  ;;  %v626_v42 = vmul.f32 %v526_v23, %v1218_v31 }
 0x1d2   : > { %666 = vperm.xlu0 %1061, %v601_v32   ;;  %669 = vperm.xlu1 %1062, %v602_v33   ;;  %v603_v44 = vmul.f32 %v365_v24, %v1218_v31  ;;  %v611_v45 = vmul.f32 %v421_v3, %v1218_v31  ;;  %v619_v46 = vmul.f32 %v477_v25, %v1218_v31 }
 0x1d3   : > { %v627_v12 = vmul.f32 %v533_v27, %v1218_v31  ;;  %v604_v48 = vmul.f32 %v372_v29, %v1218_v31  ;;  %v612_v49 = vmul.f32 %v428_v34, %v1218_v31  ;;  %v620_v51 = vmul.f32 %v484_v38, %v1218_v31 }
 0x1d4   : > { %v628_v52 = vmul.f32 %v540_v10, %v1218_v31  ;;  %v605_v53 = vmul.f32 %v379_v43, %v1218_v31  ;;  %v613_v55 = vmul.f32 %v435_v15, %v1218_v31  ;;  %v621_v56 = vmul.f32 %v491_v47, %v1218_v31 }
 0x1d5   : > { %v629_v13 = vmul.f32 %v547_v18, %v1218_v31  ;;  %v606_v58 = vmul.f32 %v386_v50, %v1218_v31  ;;  %v614_v59 = vmul.f32 %v442_v20, %v1218_v31  ;;  %v622_v60 = vmul.f32 %v498_v54, %v1218_v31  ;;  %v512_v18 = vpop.permute.xlu0 %511 }
 0x1d6   : > { %690 = vperm.xlu0 %1061, %v609_v35   ;;  %693 = vperm.xlu1 %1062, %v610_v36   ;;  %v630_v62 = vmul.f32 %v1208_v22, %v1218_v31  ;;  %v607_v63 = vmul.f32 %v393_v57, %v1218_v31  ;;  %v615_v3 = vmul.f32 %v1210_v14, %v1218_v31 }
 0x1d7   : > { %v623_v10 = vmul.f32 %v505_v61, %v1218_v31  ;;  %v631_v11 = vmul.f32 %v1212_v17, %v1218_v31  ;;  %v608_v15 = vmul.f32 %v400_v7, %v1218_v31  ;;  %v616_v16 = vmul.f32 %v1214_v26, %v1218_v31 }
 0x1d8   : > { %v624_v19 = vmul.f32 %v512_v18, %v1218_v31  ;;  %v632_v20 = vmul.f32 %v1216_v28, %v1218_v31 }
 0x1da   : > { %714 = vperm.xlu0 %1061, %v617_v37   ;;  %717 = vperm.xlu1 %1062, %v618_v39  }
 0x1de   : > { %738 = vperm.xlu0 %1061, %v625_v40   ;;  %741 = vperm.xlu1 %1062, %v626_v42  }
 0x1e2   : > { %672 = vperm.xlu0 %1061, %v603_v44   ;;  %696 = vperm.xlu1 %1062, %v611_v45  }
 0x1e6   : > { %720 = vperm.xlu0 %1061, %v619_v46   ;;  %744 = vperm.xlu1 %1062, %v627_v12  }
 0x1ea   : > { %675 = vperm.xlu0 %1061, %v604_v48   ;;  %699 = vperm.xlu1 %1062, %v612_v49  }
 0x1ee   : > { %723 = vperm.xlu0 %1061, %v620_v51   ;;  %747 = vperm.xlu1 %1062, %v628_v52  }
 0x1f2   : > { %678 = vperm.xlu0 %1061, %v605_v53   ;;  %702 = vperm.xlu1 %1062, %v613_v55  }
 0x1f6   : > { %726 = vperm.xlu0 %1061, %v621_v56   ;;  %750 = vperm.xlu1 %1062, %v629_v13  }
 0x1fa   : > { %681 = vperm.xlu0 %1061, %v606_v58   ;;  %705 = vperm.xlu1 %1062, %v614_v59  }
 0x1fe   : > { %729 = vperm.xlu0 %1061, %v622_v60   ;;  %753 = vperm.xlu1 %1062, %v630_v62  }
 0x202   : > { %684 = vperm.xlu0 %1061, %v607_v63   ;;  %708 = vperm.xlu1 %1062, %v615_v3  }
 0x206   : > { %732 = vperm.xlu0 %1061, %v623_v10   ;;  %756 = vperm.xlu1 %1062, %v631_v11  }
 0x20a   : > { %687 = vperm.xlu0 %1061, %v608_v15   ;;  %711 = vperm.xlu1 %1062, %v616_v16  }
 0x20e   : > { %735 = vperm.xlu0 %1061, %v624_v19   ;;  %759 = vperm.xlu1 %1062, %v632_v20  }
 0x251   : > { %v667_v21 = vpop.permute.xlu0 %666  ;;  %v670_v22 = vpop.permute.xlu1 %669 }
 0x252   : > { %v768_v44 = vrot.slane %v670_v22, %v1200_v41  ;;  %v764_v45 = vrot.slane %v667_v21, %v1200_v41 }
 0x254   : > { %v889_v13 = vsel %vm329_vm3, %v768_v44, %v764_v45 }
 0x255   : > { %v691_v23 = vpop.permute.xlu0 %690  ;;  %v694_v14 = vpop.permute.xlu1 %693 }
 0x256   : > { %v800_v46 = vrot.slane %v694_v14, %v1200_v41  ;;  %v796_v47 = vrot.slane %v691_v23, %v1200_v41 }
 0x258   : > { %v902_v59 = vsel %vm329_vm3, %v800_v46, %v796_v47 }
 0x259   : > { %v715_v24 = vpop.permute.xlu0 %714  ;;  %v718_v17 = vpop.permute.xlu1 %717 }
 0x25a   : > { %v832_v12 = vrot.slane %v718_v17, %v1200_v41  ;;  %v828_v48 = vrot.slane %v715_v24, %v1200_v41 }
 0x25c   : > { %v909_v60 = vsel %vm329_vm3, %v832_v12, %v828_v48 }
 0x25d   : > { %v739_v25 = vpop.permute.xlu0 %738  ;;  %v742_v27 = vpop.permute.xlu1 %741 }
 0x25e   : > { %v864_v50 = vrot.slane %v742_v27, %v1200_v41  ;;  %v860_v51 = vrot.slane %v739_v25, %v1200_v41 }
 0x260   : > { %v916_v3 = vsel %vm329_vm3, %v864_v50, %v860_v51 }
 0x261   : > { %v673_v29 = vpop.permute.xlu0 %672  ;;  %v697_v26 = vpop.permute.xlu1 %696 }
 0x262   : > { %v804_v52 = vrot.slane %v697_v26, %v1200_v41  ;;  %v772_v53 = vrot.slane %v673_v29, %v1200_v41 }
 0x264   : > { %v903_v7 = vsel %vm890_vm5, %v804_v52, %v902_v59  ;;  %v891_v10 = vsel %vm890_vm5, %v772_v53, %v889_v13 }
 0x265   : > { %v721_v30 = vpop.permute.xlu0 %720  ;;  %v745_v32 = vpop.permute.xlu1 %744 }
 0x266   : > { %v868_v55 = vrot.slane %v745_v32, %v1200_v41  ;;  %v836_v56 = vrot.slane %v721_v30, %v1200_v41 }
 0x268   : > { %v917_v16 = vsel %vm890_vm5, %v868_v55, %v916_v3  ;;  %v910_v18 = vsel %vm890_vm5, %v836_v56, %v909_v60 }
 0x269   : > { %v676_v33 = vpop.permute.xlu0 %675  ;;  %v700_v34 = vpop.permute.xlu1 %699 }
 0x26a   : > { %v808_v57 = vrot.slane %v700_v34, %v1200_v41  ;;  %v776_v58 = vrot.slane %v676_v33, %v1200_v41 }
 0x26c   : > { %v904_v21 = vsel %vm892_vm6, %v808_v57, %v903_v7  ;;  %v893_v22 = vsel %vm892_vm6, %v776_v58, %v891_v10 }
 0x26d   : > { %v1257_v35 = vpop.permute.xlu0 %723  ;;  %v1259_v36 = vpop.permute.xlu1 %747 }
 0x26e   : > { %v840_v23 = vrot.slane %v1257_v35, %v1200_v41  ;;  %v872_v24 = vrot.slane %v1259_v36, %v1200_v41 }
 0x270   : > { %v918_v12 = vsel %vm892_vm6, %v872_v24, %v917_v16 }
 0x271   : > { %v679_v28 = vpop.permute.xlu0 %678  ;;  %v703_v31 = vpop.permute.xlu1 %702 }
 0x272   : > { %v812_v61 = vrot.slane %v703_v31, %v1200_v41  ;;  %v780_v62 = vrot.slane %v679_v28, %v1200_v41 }
 0x274   : > { %v905_v17 = vsel %vm894_vm7, %v812_v61, %v904_v21  ;;  %v895_v25 = vsel %vm894_vm7, %v780_v62, %v893_v22 }
 0x275   : > { %v1261_v37 = vpop.permute.xlu0 %726  ;;  %v1263_v38 = vpop.permute.xlu1 %750 }
 0x276   : > { %v844_v27 = vrot.slane %v1261_v37, %v1200_v41  ;;  %v876_v26 = vrot.slane %v1263_v38, %v1200_v41  ;;  %v911_v37 = vsel %vm892_vm6, %v840_v23, %v910_v18 }
 0x278   : > { %v919_v51 = vsel %vm894_vm7, %v876_v26, %v918_v12 }
 0x279   : > { %v682_v39 = vpop.permute.xlu0 %681  ;;  %v706_v40 = vpop.permute.xlu1 %705 }
 0x27a   : > { %v784_v11 = vrot.slane %v682_v39, %v1200_v41  ;;  %v816_v19 = vrot.slane %v706_v40, %v1200_v41 }
 0x27c   : > { %v897_v30 = vsel %vm896_vm8, %v784_v11, %v895_v25  ;;  %v906_v35 = vsel %vm896_vm8, %v816_v19, %v905_v17 }
 0x27d   : > { %v1265_v42 = vpop.permute.xlu0 %729  ;;  %v1267_v43 = vpop.permute.xlu1 %753 }
 0x27e   : > { %v848_v32 = vrot.slane %v1265_v42, %v1200_v41  ;;  %v880_v38 = vrot.slane %v1267_v43, %v1200_v41  ;;  %v912_v42 = vsel %vm894_vm7, %v844_v27, %v911_v37 }
 0x280   : > { %v913_v48 = vsel %vm896_vm8, %v848_v32, %v912_v42 }
 0x281   : > { %v685_v49 = vpop.permute.xlu0 %684  ;;  %v709_v54 = vpop.permute.xlu1 %708 }
 0x282   : > { %v788_v20 = vrot.slane %v685_v49, %v1200_v41  ;;  %v820_v14 = vrot.slane %v709_v54, %v1200_v41  ;;  %v920_v54 = vsel %vm896_vm8, %v880_v38, %v919_v51 }
 0x284   : > { %v899_v31 = vsel %vm898_vm9, %v788_v20, %v897_v30  ;;  %v907_v39 = vsel %vm898_vm9, %v820_v14, %v906_v35 }
 0x285   : > { %v733_v63 = vpop.permute.xlu0 %732  ;;  %v757_v15 = vpop.permute.xlu1 %756 }
 0x286   : > { %v852_v36 = vrot.slane %v733_v63, %v1200_v41  ;;  %v884_v44 = vrot.slane %v757_v15, %v1200_v41 }
 0x288   : > { %v914_v53 = vsel %vm898_vm9, %v852_v36, %v913_v48  ;;  %v921_v13 = vsel %vm898_vm9, %v884_v44, %v920_v54 }
 0x289   : > { %v688_v29 = vpop.permute.xlu0 %687  ;;  %v712_v33 = vpop.permute.xlu1 %711 }
 0x28a   : > { %v792_v34 = vrot.slane %v688_v29, %v1200_v41  ;;  %v824_v28 = vrot.slane %v712_v33, %v1200_v41 }
 0x28c   : > { %v901_v40 = vsel %vm900_vm10, %v792_v34, %v899_v31  ;;  %v908_v46 = vsel %vm900_vm10, %v824_v28, %v907_v39 }
 0x28d   : > { %v736_v45 = vpop.permute.xlu0 %735  ;;  %v928_v47 = vsel %vm927_vm11, %v901_v40, 0.0  ;;  %v760_v49 = vpop.permute.xlu1 %759  ;;  %v931_v50 = vsel %vm927_vm11, %v908_v46, 0.0 }
 0x28e   : > { %v856_v43 = vrot.slane %v736_v45, %v1200_v41  ;;  %929 = vadd.xlane.f32.xlu0 %v928_v47  ;;  %v888_v52 = vrot.slane %v760_v49, %v1200_v41  ;;  %932 = vadd.xlane.f32.xlu1 %v931_v50 }
 0x290   : > { %v915_v55 = vsel %vm900_vm10, %v856_v43, %v914_v53  ;;  %v922_v57 = vsel %vm900_vm10, %v888_v52, %v921_v13 }
 0x291   : > { %v934_v56 = vsel %vm927_vm11, %v915_v55, 0.0  ;;  %v937_v58 = vsel %vm927_vm11, %v922_v57, 0.0 }
 0x292   : > { %935 = vadd.xlane.f32.xlu0 %v934_v56 }
 0x296   : > { %938 = vadd.xlane.f32.xlu0 %v937_v58 }
 0x31b   : > { %v930_v59 = vpop.xlane.xlu0 %929  ;;  %v933_v60 = vpop.xlane.xlu1 %932 }
 0x31c   : > { %v1044_v41 = vmul.f32 -1.442695, %v930_v59  ;;  %v1045_v61 = vmul.f32 -1.442695, %v933_v60 }
 0x31e   : > { %1063 = vpow2.f32 %v1044_v41 }
 0x31f   : > { %1065 = vpow2.f32 %v1045_v61  ;;  %v936_v62 = vpop.xlane.xlu0 %935 }
 0x320   : > { %v1046_v63 = vmul.f32 -1.442695, %v936_v62 }
 0x322   : > { %1067 = vpow2.f32 %v1046_v63 }
 0x323   : > { %v939_v3 = vpop.xlane.xlu0 %938 }
 0x324   : > { %v1047_v7 = vmul.f32 -1.442695, %v939_v3 }
 0x326   : > { %1069 = vpow2.f32 %v1047_v7 }
 0x328   : > { %v1064_v10 = vpop.eup %1063 }
 0x329   : > { %v1066_v11 = vpop.eup %1065  ;;  %v952_v15 = vadd.f32 1.0, %v1064_v10 }
 0x32a   : > { %v953_v16 = vadd.f32 1.0, %v1066_v11 }
 0x32b   : > { %1071 = vrcp.f32 %v952_v15 }
 0x32c   : > { %v1068_v18 = vpop.eup %1067  ;;  %1073 = vrcp.f32 %v953_v16 }
 0x32d   : > { %v954_v19 = vadd.f32 1.0, %v1068_v18 }
 0x32f   : > { %1075 = vrcp.f32 %v954_v19 }
 0x330   : > { %v1070_v20 = vpop.eup %1069 }
 0x331   : > { %v955_v21 = vadd.f32 1.0, %v1070_v20 }
 0x333   : > { %1077 = vrcp.f32 %v955_v21 }
 0x335   : > { %v1072_v22 = vpop.eup %1071 }
 0x336   : > { %v1074_v23 = vpop.eup %1073  ;;  %v964_v14 = vmul.f32 %v1072_v22, %v1128_v2  ;;  %v965_v24 = vmul.f32 %v1072_v22, %v1132_v4 }
 0x337   : > { %v966_v17 = vmul.f32 %v1074_v23, %v1140_v8  ;;  %v967_v25 = vmul.f32 %v1074_v23, %v1142_v9 }
 0x338   : > { %972 = vst [vmem:[%s170_s30] sm:$0xff] %v964_v14  ;;  %973 = vst [vmem:[%s170_s30 + $0x8] sm:$0xff] %v965_v24 }
 0x339   : > { %v1076_v27 = vpop.eup %1075  ;;  %974 = vst [vmem:[%s170_s30 + $0x10] sm:$0xff] %v966_v17  ;;  %975 = vst [vmem:[%s170_s30 + $0x18] sm:$0xff] %v967_v25 }
 0x33a   : > { %v968_v29 = vmul.f32 %v1076_v27, %v1124_v0  ;;  %v969_v26 = vmul.f32 %v1076_v27, %v1126_v1 }
 0x33c   : > { %976 = vst [vmem:[%s170_s30 + $0x20] sm:$0xff] %v968_v29  ;;  %977 = vst [vmem:[%s170_s30 + $0x28] sm:$0xff] %v969_v26 }
 0x33d   : > { %v1078_v30 = vpop.eup %1077 }
 0x33e   : > { %v970_v2 = vmul.f32 %v1078_v30, %v1134_v5  ;;  %v971_v4 = vmul.f32 %v1078_v30, %v1136_v6 }
 0x340   : > { %978 = vst [vmem:[%s170_s30 + $0x30] sm:$0xff] %v970_v2  ;;  %979 = vst [vmem:[%s170_s30 + $0x38] sm:$0xff] %v971_v4 }
 0x341 PF: > { %s13_s12 = sadd.s32 1, %s1085_s12  }
 0x342   : > { %p10_p4 = scmp.ge.s32.totalorder %s13_s12, 4  }
 0x344   :  { %12 = sbr.rel (!%p10_p4) target bundleno = 1 (0x1), region = 62 }

</bundles_post_ra>
